<compile_context>
chip_gen: v7x
topology: tpu7x:2x2x1
jax: 0.10.0
libtpu: 0.0.40
codegen_flags: <defaults>
</compile_context>

<pallas_src>
import jax
import jax.numpy as jnp
import numpy as np
from jax.experimental import pallas as pl
from jax.experimental.pallas import tpu as pltpu


def attention_kernel(h_ref, e_ref, whT_ref, weT_ref, b_ref, v_ref,
                     ctx_ref, w_ref):
    block_b, S, H = h_ref.shape
    I = e_ref.shape[2]

    # Fold (batch, seq) into the matmul M dimension.
    h2 = h_ref[...].reshape(block_b * S, H)      # (BS, H)  compute dtype
    e2 = e_ref[...].reshape(block_b * S, I)      # (BS, I)  compute dtype

    # Linear(cat(h, e)) = h @ Wh^T + e @ We^T + b  (f32 accumulation on MXU).
    z = (jnp.dot(h2, whT_ref[...], preferred_element_type=jnp.float32)
         + jnp.dot(e2, weT_ref[...], preferred_element_type=jnp.float32)
         + b_ref[...])                            # (BS, H) f32
    t = jnp.tanh(z)                               # EUP, f32

    # scores[b, s] = <t[b, s, :], v>  — VPU multiply + lane reduce.
    tv = t * v_ref[...]                           # (BS, H) f32
    scores = jnp.sum(tv.reshape(block_b, S, H), axis=-1)   # (block_b, S)

    # softmax over the sequence axis (f32; exp + approx reciprocal on EUP).
    m = jnp.max(scores, axis=-1, keepdims=True)
    p = jnp.exp(scores - m)
    denom = jnp.sum(p, axis=-1, keepdims=True)
    w = p * pl.reciprocal(denom, approx=True)     # (block_b, S) f32
    w_ref[...] = w                                # dense (block_b, S) slab

    # context[b] = attn_weights[b] @ encoder_outputs[b]  -> (block_b, 1, I)
    ctx_ref[...] = jnp.einsum(
        "bqs,bsi->bqi",
        w[:, None, :].astype(e_ref.dtype), e_ref[...],
        preferred_element_type=jnp.float32)


def _choose_block_b(B, S, H, I, act_itemsize):
    """Largest batch block whose (double-buffered) activation tiles stay well
    under the default scoped-VMEM budget (conservative for v7x's 64 MiB)."""
    budget = 8 * 1024 * 1024                      # bytes for the h/e tiles
    per_b = 2 * 2 * S * (H + I) * act_itemsize    # 2 tensors x double-buffer
    bb = max(1, min(B, budget // max(per_b, 1)))
    while B % bb:                                 # keep the grid exact
        bb -= 1
    return bb


def attention_forward(hidden, encoder_outputs, W, b, v,
                      *, compute_dtype=jnp.bfloat16, block_b=None):
    """hidden: (B,S,H), encoder_outputs: (B,S,I), W: (H, H+I), b: (H,), v: (H,).
    Returns (context (B,1,I) f32, attn_weights (B,S) f32)."""
    B, S, H = hidden.shape
    I = encoder_outputs.shape[-1]

    # Split the concat-Linear weight and pre-transpose for (rows, K) @ (K, H).
    whT = W[:, :H].T.astype(compute_dtype)        # (H, H)
    weT = W[:, H:].T.astype(compute_dtype)        # (I, H)
    b2 = b.reshape(1, H).astype(jnp.float32)
    v2 = v.reshape(1, H).astype(jnp.float32)
    h = hidden.astype(compute_dtype)
    e = encoder_outputs.astype(compute_dtype)

    if block_b is None:
        block_b = _choose_block_b(B, S, H, I, np.dtype(compute_dtype).itemsize)
    assert B % block_b == 0, "block_b must divide the batch"
    grid = (B // block_b,)

    # Advisory cost estimate so XLA schedules this (tiny) call sensibly.
    flops = 2 * B * S * H * (H + I) + 2 * B * S * I + 6 * B * S * H
    transcendentals = B * S * (H + 1)
    bytes_accessed = (h.size * h.dtype.itemsize + e.size * e.dtype.itemsize
                      + whT.size * whT.dtype.itemsize
                      + weT.size * weT.dtype.itemsize
                      + (b2.size + v2.size + B * I + B * S) * 4)

    ctx, attn_w = pl.pallas_call(
        attention_kernel,
        out_shape=(jax.ShapeDtypeStruct((B, 1, I), jnp.float32),
                   jax.ShapeDtypeStruct((B, S), jnp.float32)),
        grid_spec=pl.GridSpec(
            grid=grid,
            in_specs=[
                pl.BlockSpec((block_b, S, H), lambda bi: (bi, 0, 0)),  # hidden
                pl.BlockSpec((block_b, S, I), lambda bi: (bi, 0, 0)),  # enc out
                # Grid-invariant weight tiles (constant index_map). For very
                # large H/I on v7x, pl.Buffered(1) here would avoid
                # double-buffering them in the smaller 64 MiB VMEM.
                pl.BlockSpec((H, H), lambda bi: (0, 0)),               # Wh^T
                pl.BlockSpec((I, H), lambda bi: (0, 0)),               # We^T
                pl.BlockSpec((1, H), lambda bi: (0, 0)),               # bias
                pl.BlockSpec((1, H), lambda bi: (0, 0)),               # v
            ],
            out_specs=[
                pl.BlockSpec((block_b, 1, I), lambda bi: (bi, 0, 0)),  # context
                pl.BlockSpec((block_b, S), lambda bi: (bi, 0)),        # weights
            ]),
        compiler_params=pltpu.CompilerParams(
            dimension_semantics=("parallel",)),
        cost_estimate=pl.CostEstimate(flops=flops,
                                      transcendentals=transcendentals,
                                      bytes_accessed=bytes_accessed),
    )(h, e, whT, weT, b2, v2)
    return ctx, attn_w


def attention_reference(hidden, encoder_outputs, W, b, v):
    cat = jnp.concatenate([hidden, encoder_outputs], axis=2)
    t = jnp.tanh(cat @ W.T + b)
    scores = jnp.einsum("bsh,h->bs", t, v)
    w = jax.nn.softmax(scores, axis=1)
    ctx = jnp.einsum("bs,bsi->bi", w, encoder_outputs)[:, None, :]
    return ctx, w


if __name__ == "__main__":
    B, S, H, I = 2, 8, 32, 16     # batch, seq, hidden_size, input_size

    key = jax.random.PRNGKey(0)
    k1, k2, k3, k4, k5 = jax.random.split(key, 5)

    # Deterministic parameter init (Linear(hidden+input -> hidden) and v).
    bound = 1.0 / np.sqrt(H + I)
    W = jax.random.uniform(k1, (H, H + I), jnp.float32, -bound, bound)
    b = jax.random.uniform(k2, (H,), jnp.float32, -bound, bound)
    v = jax.random.uniform(k3, (H,), jnp.float32, 0.0, 1.0)   # torch.rand
    hidden = jax.random.normal(k4, (B, S, H), jnp.float32)
    encoder_outputs = jax.random.normal(k5, (B, S, I), jnp.float32)

    ctx_gold, w_gold = attention_reference(hidden, encoder_outputs, W, b, v)
    ctx_gold, w_gold = np.asarray(ctx_gold), np.asarray(w_gold)

    # 1) f32 path: checks the forward-pass semantics (tolerance limited only
    #    by the approximate EUP reciprocal in the softmax normalization).
    ctx32, w32 = attention_forward(hidden, encoder_outputs, W, b, v,
                                   compute_dtype=jnp.float32)
    ctx32 = jax.block_until_ready(ctx32)
    w32 = jax.block_until_ready(w32)
    np.testing.assert_allclose(np.asarray(w32), w_gold, rtol=5e-3, atol=5e-3)
    np.testing.assert_allclose(np.asarray(ctx32), ctx_gold, rtol=5e-3, atol=5e-3)

    # 2) Default bf16 fast path: bf16 MXU inputs, f32 accumulation.
    ctx16, w16 = attention_forward(hidden, encoder_outputs, W, b, v)
    ctx16 = jax.block_until_ready(ctx16)
    w16 = jax.block_until_ready(w16)
    np.testing.assert_allclose(np.asarray(w16), w_gold, rtol=3e-2, atol=3e-2)
    np.testing.assert_allclose(np.asarray(ctx16), ctx_gold, rtol=3e-2, atol=3e-2)

    assert ctx16.shape == (B, 1, I) and w16.shape == (B, S)
    print("KERNEL_OK")
</pallas_src>

<mosaic_0001>
module attributes {stable_mosaic.version = 11 : i64} {
  func.func @attention_kernel(%arg0: i32, %arg1: memref<2x8x32xf32, #tpu.memory_space<vmem>>, %arg2: memref<2x8x16xf32, #tpu.memory_space<vmem>>, %arg3: memref<32x32xf32, #tpu.memory_space<vmem>>, %arg4: memref<16x32xf32, #tpu.memory_space<vmem>>, %arg5: memref<1x32xf32, #tpu.memory_space<vmem>>, %arg6: memref<1x32xf32, #tpu.memory_space<vmem>>, %arg7: memref<2x1x16xf32, #tpu.memory_space<vmem>>, %arg8: memref<2x8xf32, #tpu.memory_space<vmem>>) attributes {dimension_semantics = [#tpu.dimension_semantics<parallel>], iteration_bounds = array<i64: 1>, scalar_prefetch = 0 : i64, scratch_operands = 0 : i64, tpu.core_type = #tpu.core_type<tc>, window_params = [{transform_indices = @transform_0, window_bounds = array<i64: 2, 8, 32>}, {transform_indices = @transform_1, window_bounds = array<i64: 2, 8, 16>}, {pipeline_mode = #tpu.pipeline_mode<synchronous>, transform_indices = @transform_2, window_bounds = array<i64: 32, 32>}, {pipeline_mode = #tpu.pipeline_mode<synchronous>, transform_indices = @transform_3, window_bounds = array<i64: 16, 32>}, {pipeline_mode = #tpu.pipeline_mode<synchronous>, transform_indices = @transform_4, window_bounds = array<i64: 1, 32>}, {pipeline_mode = #tpu.pipeline_mode<synchronous>, transform_indices = @transform_5, window_bounds = array<i64: 1, 32>}, {transform_indices = @transform_6, window_bounds = array<i64: 2, 1, 16>}, {transform_indices = @transform_7, window_bounds = array<i64: 2, 8>}]} {
    %c0 = arith.constant 0 : index
    %c0_0 = arith.constant 0 : index
    %c0_1 = arith.constant 0 : index
    %0 = vector.load %arg1[%c0, %c0_0, %c0_1] : memref<2x8x32xf32, #tpu.memory_space<vmem>>, vector<2x8x32xf32>
    %1 = vector.shape_cast %0 : vector<2x8x32xf32> to vector<16x32xf32>
    %c0_2 = arith.constant 0 : index
    %c0_3 = arith.constant 0 : index
    %c0_4 = arith.constant 0 : index
    %2 = vector.load %arg2[%c0_2, %c0_3, %c0_4] : memref<2x8x16xf32, #tpu.memory_space<vmem>>, vector<2x8x16xf32>
    %3 = vector.shape_cast %2 : vector<2x8x16xf32> to vector<16x16xf32>
    %c0_5 = arith.constant 0 : index
    %c0_6 = arith.constant 0 : index
    %4 = vector.load %arg3[%c0_5, %c0_6] : memref<32x32xf32, #tpu.memory_space<vmem>>, vector<32x32xf32>
    %cst = arith.constant dense<0.000000e+00> : vector<16x32xf32>
    %5 = tpu.matmul %1, %4, %cst {dimension_numbers = #tpu.dot_dimension_numbers<[1], [0], [0], [1], [0, 0, 1, 1], [], []>} : vector<16x32xf32>, vector<32x32xf32>, vector<16x32xf32> -> vector<16x32xf32>
    %c0_7 = arith.constant 0 : index
    %c0_8 = arith.constant 0 : index
    %6 = vector.load %arg4[%c0_7, %c0_8] : memref<16x32xf32, #tpu.memory_space<vmem>>, vector<16x32xf32>
    %cst_9 = arith.constant dense<0.000000e+00> : vector<16x32xf32>
    %7 = tpu.matmul %3, %6, %cst_9 {dimension_numbers = #tpu.dot_dimension_numbers<[1], [0], [0], [1], [0, 0, 1, 1], [], []>} : vector<16x16xf32>, vector<16x32xf32>, vector<16x32xf32> -> vector<16x32xf32>
    %8 = arith.addf %5, %7 : vector<16x32xf32>
    %c0_10 = arith.constant 0 : index
    %c0_11 = arith.constant 0 : index
    %9 = vector.load %arg5[%c0_10, %c0_11] : memref<1x32xf32, #tpu.memory_space<vmem>>, vector<1x32xf32>
    %10 = vector.broadcast %9 : vector<1x32xf32> to vector<16x32xf32>
    %11 = arith.addf %8, %10 : vector<16x32xf32>
    %12 = math.tanh %11 : vector<16x32xf32>
    %c0_12 = arith.constant 0 : index
    %c0_13 = arith.constant 0 : index
    %13 = vector.load %arg6[%c0_12, %c0_13] : memref<1x32xf32, #tpu.memory_space<vmem>>, vector<1x32xf32>
    %14 = vector.broadcast %13 : vector<1x32xf32> to vector<16x32xf32>
    %15 = arith.mulf %12, %14 : vector<16x32xf32>
    %16 = vector.shape_cast %15 : vector<16x32xf32> to vector<2x8x32xf32>
    %cst_14 = arith.constant dense<0.000000e+00> : vector<2x8xf32>
    %17 = vector.multi_reduction <add>, %16, %cst_14 [2] : vector<2x8x32xf32> to vector<2x8xf32>
    %cst_15 = arith.constant dense<0xFF800000> : vector<2xf32>
    %18 = vector.multi_reduction <maximumf>, %17, %cst_15 [1] : vector<2x8xf32> to vector<2xf32>
    %19 = vector.shape_cast %18 : vector<2xf32> to vector<2x1xf32>
    %20 = vector.broadcast %19 : vector<2x1xf32> to vector<2x8xf32>
    %21 = arith.subf %17, %20 : vector<2x8xf32>
    %22 = math.exp %21 : vector<2x8xf32>
    %cst_16 = arith.constant dense<0.000000e+00> : vector<2xf32>
    %23 = vector.multi_reduction <add>, %22, %cst_16 [1] : vector<2x8xf32> to vector<2xf32>
    %24 = vector.shape_cast %23 : vector<2xf32> to vector<2x1xf32>
    %25 = tpu.reciprocal %24 {approx = true} : vector<2x1xf32> -> vector<2x1xf32>
    %26 = vector.broadcast %25 : vector<2x1xf32> to vector<2x8xf32>
    %27 = arith.mulf %22, %26 : vector<2x8xf32>
    %c0_17 = arith.constant 0 : index
    %c0_18 = arith.constant 0 : index
    %28 = vector.load %arg8[%c0_17, %c0_18] : memref<2x8xf32, #tpu.memory_space<vmem>>, vector<2x8xf32>
    tpu.vector_store %arg8[%c0_17, %c0_18], %27 {strides = array<i32>} : memref<2x8xf32, #tpu.memory_space<vmem>>, vector<2x8xf32>,
    %29 = vector.shape_cast %27 : vector<2x8xf32> to vector<2x1x8xf32>
    %c0_19 = arith.constant 0 : index
    %c0_20 = arith.constant 0 : index
    %c0_21 = arith.constant 0 : index
    %30 = vector.load %arg2[%c0_19, %c0_20, %c0_21] : memref<2x8x16xf32, #tpu.memory_space<vmem>>, vector<2x8x16xf32>
    "tpu.trace_start"() <{level = 10 : i32, message = "bqs,bsi->bqi"}> : () -> ()
    %cst_22 = arith.constant dense<0.000000e+00> : vector<2x1x16xf32>
    %31 = tpu.matmul %29, %30, %cst_22 {dimension_numbers = #tpu.dot_dimension_numbers<[2], [1], [1], [2], [0, 0, 0, 1, 1, 2], [0], [0]>} : vector<2x1x8xf32>, vector<2x8x16xf32>, vector<2x1x16xf32> -> vector<2x1x16xf32>
    "tpu.trace_stop"() : () -> ()
    %c0_23 = arith.constant 0 : index
    %c0_24 = arith.constant 0 : index
    %c0_25 = arith.constant 0 : index
    %32 = vector.load %arg7[%c0_23, %c0_24, %c0_25] : memref<2x1x16xf32, #tpu.memory_space<vmem>>, vector<2x1x16xf32>
    tpu.vector_store %arg7[%c0_23, %c0_24, %c0_25], %31 {strides = array<i32>} : memref<2x1x16xf32, #tpu.memory_space<vmem>>, vector<2x1x16xf32>,
    return
  }
  func.func @transform_0(%arg0: i32) -> (i32, i32, i32) {
    %c0_i32 = arith.constant 0 : i32
    %c0_i32_0 = arith.constant 0 : i32
    %c0_i32_1 = arith.constant 0 : i32
    return %arg0, %c0_i32, %c0_i32_0 : i32, i32, i32
  }
  func.func @transform_1(%arg0: i32) -> (i32, i32, i32) {
    %c0_i32 = arith.constant 0 : i32
    %c0_i32_0 = arith.constant 0 : i32
    %c0_i32_1 = arith.constant 0 : i32
    return %arg0, %c0_i32, %c0_i32_0 : i32, i32, i32
  }
  func.func @transform_2(%arg0: i32) -> (i32, i32) {
    %c0_i32 = arith.constant 0 : i32
    %c0_i32_0 = arith.constant 0 : i32
    %c0_i32_1 = arith.constant 0 : i32
    return %c0_i32, %c0_i32_0 : i32, i32
  }
  func.func @transform_3(%arg0: i32) -> (i32, i32) {
    %c0_i32 = arith.constant 0 : i32
    %c0_i32_0 = arith.constant 0 : i32
    %c0_i32_1 = arith.constant 0 : i32
    return %c0_i32, %c0_i32_0 : i32, i32
  }
  func.func @transform_4(%arg0: i32) -> (i32, i32) {
    %c0_i32 = arith.constant 0 : i32
    %c0_i32_0 = arith.constant 0 : i32
    %c0_i32_1 = arith.constant 0 : i32
    return %c0_i32, %c0_i32_0 : i32, i32
  }
  func.func @transform_5(%arg0: i32) -> (i32, i32) {
    %c0_i32 = arith.constant 0 : i32
    %c0_i32_0 = arith.constant 0 : i32
    %c0_i32_1 = arith.constant 0 : i32
    return %c0_i32, %c0_i32_0 : i32, i32
  }
  func.func @transform_6(%arg0: i32) -> (i32, i32, i32) {
    %c0_i32 = arith.constant 0 : i32
    %c0_i32_0 = arith.constant 0 : i32
    %c0_i32_1 = arith.constant 0 : i32
    return %arg0, %c0_i32, %c0_i32_0 : i32, i32, i32
  }
  func.func @transform_7(%arg0: i32) -> (i32, i32) {
    %c0_i32 = arith.constant 0 : i32
    %c0_i32_0 = arith.constant 0 : i32
    return %arg0, %c0_i32 : i32, i32
  }
}

</mosaic_0001>

<bundles_post_ra>
// kernel: tpu_custom_call.1
= control target key start
LH: loop header
LB: loop body
LE: loop exit
PB: predicated region body
PF: predicated region fallthrough
CT: control target
= control target key end

     0   :  { %13 = vsyncpa [#allocation3], 0  ;;  %s963_s0 = inlined_call_operand.hbm [shape: f32[2,8,32], index: 0, kind: input, shape index: {}]   ;;  %s964_s1 = inlined_call_operand.hbm [shape: f32[2,8,16], index: 1, kind: input, shape index: {}]   ;;  %s965_s2 = inlined_call_operand.hbm [shape: f32[32,32], index: 2, kind: input, shape index: {}]   ;;  %s966_s3 = inlined_call_operand.hbm [shape: f32[16,32], index: 3, kind: input, shape index: {}]   ;;  %s967_s4 = inlined_call_operand.vmem [shape: f32[1,32], index: 4, kind: input, shape index: {}]   ;;  %s968_s5 = inlined_call_operand.vmem [shape: f32[1,32], index: 5, kind: input, shape index: {}]   ;;  %s969_s6 = inlined_call_operand.hbm [shape: f32[2,1,16], index: 6, kind: output, shape index: {0}]   ;;  %s970_s7 = inlined_call_operand.hbm [shape: f32[2,8], index: 7, kind: output, shape index: {1}]  }
   0x1   :  { %14 = vsyncpa [#allocation6], 0 }
   0x2   :  { %15 = vsyncpa [#allocation9], 0 }
   0x3   :  { %16 = vsyncpa [#allocation4], 0 }
   0x4   :  { %17 = vsyncpa [#allocation12], 0  ;;  %s786_s24 = smov [#allocation5]   ;;  %s787_s26 = smov [#allocation2]  }
   0x5   :  { %s35_s25 = sshll.u32 %s786_s24, 4  ;;  %s23_s27 = sshll.u32 %s787_s26, 4  ;;  %s36_s25 = int_to_ptr.vmem [resolvable:$true] %s35_s25  ;;  %s839_s27 = int_to_ptr.vmem [resolvable:$true] %s23_s27 }
   0x6   :  { %s644_s30 = scalar_lea.hbm %s964_s1, 256 }
   0x7   :  { %p645_p0 = scmp.ne.s32.totalorder %s964_s1, %s644_s30  ;;  %p648_p1 = scmp.lt.u32.totalorder %s644_s30, %s964_s1 }
   0x9   :  { %p650_p2 = pnand %p648_p1, %p645_p0 }
   0xb   :  { %653 = shalt.err (!%p650_p2)
}
   0xc   :  { %s654_s12 = scalar_lea.vmem %s36_s25, 256  ;;  %p659_p4 = scmp.lt.s32.totalorder %s36_s25, %s36_s25 }
   0xd   :  { %p655_p3 = scmp.ne.s32.totalorder %s36_s25, %s654_s12  ;;  %p660_p5 = scmp.lt.s32.totalorder %s654_s12, %s654_s12 }
   0xf   :  { %p661_p6 = por %p660_p5, %p659_p4 }
  0x11   :  { %p662_p7 = pnand %p661_p6, %p655_p3 }
  0x13   :  { %665 = shalt.err (!%p662_p7)
}
  0x14   :  { %s788_s13 = smov 128   ;;  %s789_s14 = smov 8  }
  0x15   :  { %41 = dma.hbm_to_vmem [thread:$0]  %s964_s1, 256, %s36_s25, [#allocation6], %s788_s13, %s788_s13, %s789_s14  }
  0x16   :  { %s666_s19 = scalar_lea.hbm %s963_s0, 256 }
  0x17   :  { %p667_p8 = scmp.ne.s32.totalorder %s963_s0, %s666_s19  ;;  %p670_p9 = scmp.lt.u32.totalorder %s666_s19, %s963_s0 }
  0x19   :  { %p672_p10 = pnand %p670_p9, %p667_p8 }
  0x1b   :  { %675 = shalt.err (!%p672_p10)
}
  0x1c   :  { %s676_s24 = scalar_lea.vmem %s839_s27, 256  ;;  %p681_p12 = scmp.lt.s32.totalorder %s839_s27, %s839_s27 }
  0x1d   :  { %p677_p11 = scmp.ne.s32.totalorder %s839_s27, %s676_s24  ;;  %p682_p13 = scmp.lt.s32.totalorder %s676_s24, %s676_s24 }
  0x1f   :  { %p683_p0 = por %p682_p13, %p681_p12 }
  0x21   :  { %p684_p1 = pnand %p683_p0, %p677_p11 }
  0x23   :  { %687 = shalt.err (!%p684_p1)
}
  0x24   :  { %29 = dma.hbm_to_vmem [thread:$0]  %s963_s0, 256, %s839_s27, [#allocation3], %s788_s13, %s788_s13, %s789_s14  }
  0x25   :  { %s790_s26 = smov [#allocation7]   ;;  %s791_s29 = smov [#allocation8]  }
  0x26   :  { %s47_s28 = sshll.u32 %s790_s26, 4  ;;  %s59_s30 = sshll.u32 %s791_s29, 4  ;;  %s48_s28 = int_to_ptr.vmem [resolvable:$true] %s47_s28  ;;  %s876_s30 = int_to_ptr.vmem [resolvable:$true] %s59_s30 }
  0x27   :  { %s688_s10 = scalar_lea.hbm %s965_s2, 512 }
  0x28   :  { %p689_p2 = scmp.ne.s32.totalorder %s965_s2, %s688_s10  ;;  %p692_p3 = scmp.lt.u32.totalorder %s688_s10, %s965_s2 }
  0x2a   :  { %p694_p4 = pnand %p692_p3, %p689_p2 }
  0x2c   :  { %697 = shalt.err (!%p694_p4)
}
  0x2d   :  { %s698_s0 = scalar_lea.vmem %s48_s28, 512  ;;  %p703_p6 = scmp.lt.s32.totalorder %s48_s28, %s48_s28 }
  0x2e   :  { %p699_p5 = scmp.ne.s32.totalorder %s48_s28, %s698_s0  ;;  %p704_p7 = scmp.lt.s32.totalorder %s698_s0, %s698_s0 }
  0x30   :  { %p705_p8 = por %p704_p7, %p703_p6 }
  0x32   :  { %p706_p9 = pnand %p705_p8, %p699_p5 }
  0x34   :  { %709 = shalt.err (!%p706_p9)
}
  0x35   :  { %53 = dma.hbm_to_vmem [thread:$0]  %s965_s2, 512, %s48_s28, [#allocation6], %s788_s13, %s788_s13, %s789_s14  }
  0x36   :  { %s710_s20 = scalar_lea.hbm %s966_s3, 256 }
  0x37   :  { %p711_p10 = scmp.ne.s32.totalorder %s966_s3, %s710_s20  ;;  %p714_p11 = scmp.lt.u32.totalorder %s710_s20, %s966_s3 }
  0x39   :  { %p716_p12 = pnand %p714_p11, %p711_p10 }
  0x3b   :  { %719 = shalt.err (!%p716_p12)
}
  0x3c   :  { %s720_s1 = scalar_lea.vmem %s876_s30, 256  ;;  %p725_p0 = scmp.lt.s32.totalorder %s876_s30, %s876_s30 }
  0x3d   :  { %p721_p13 = scmp.ne.s32.totalorder %s876_s30, %s720_s1  ;;  %p726_p1 = scmp.lt.s32.totalorder %s720_s1, %s720_s1 }
  0x3f   :  { %p727_p2 = por %p726_p1, %p725_p0 }
  0x41   :  { %p728_p3 = pnand %p727_p2, %p721_p13 }
  0x43   :  { %731 = shalt.err (!%p728_p3)
}
  0x44   :  { %65 = dma.hbm_to_vmem [thread:$0]  %s966_s3, 256, %s876_s30, [#allocation9], %s788_s13, %s788_s13, %s789_s14  }
  0x45   :  { %776 = dma.done.wait [#allocation3], 256  }
  0x46   :  { %777 = vsyncadd [#allocation3], 4294967040 }
  0x47   :  { %778 = dma.done.wait [#allocation6], 768  }
  0x48   :  { %779 = vsyncadd [#allocation6], 4294966528 }
  0x49   :  { %780 = dma.done.wait [#allocation9], 256  }
  0x4a   :  { %781 = vsyncadd [#allocation9], 4294967040  ;;  %vm92_vm0 = vcmask 130048   ;;  %v90_v0 = vld [vmem:[#allocation8] sm:$0xff]  ;;  %v91_v1 = vld [vmem:[#allocation8 + $0x8] sm:$0xff]  ;;  %vm174_vm1 = vcmask 261120   ;;  %v284_v25 = vlaneseq }
  0x4b   :  { %v913_v2 = vld [vmem:[#allocation5] sm:$0xff]  ;;  %v605_v3 = vpack.c.bf16 %v91_v1, %v90_v0  ;;  %v86_v4 = vld [vmem:[#allocation7] sm:$0xff]  ;;  %v87_v5 = vld [vmem:[#allocation7 + $0x8] sm:$0xff]  ;;  %vm294_vm2 = vcmask 1041409   ;;  %vm297_vm3 = vcmask 58368   ;;  %v792_v35 = vmov 0  }
  0x4c   :  { %581 = vmatprep.mubr.msk.f32.mxu0 %vm92_vm0, %v913_v2  ;;  %v609_v6 = vpack.c.bf16 %v87_v5, %v86_v4  ;;  %v88_v7 = vld [vmem:[#allocation7 + $0x10] sm:$0xff]  ;;  %v89_v8 = vld [vmem:[#allocation7 + $0x18] sm:$0xff]  ;;  %v82_v11 = vld [vmem:[#allocation2] sm:$0xff]  ;;  %v285_v26 = vand.u32 127, %v284_v25  ;;  %v287_v27 = vshrl.u32 %v284_v25, 7  ;;  %633 = vset.pattern.permute.xlu0 %v792_v35  ;;  %v793_v58 = vmov 0.0  }
  0x4d   :  { %606 = vmatprep.subr.bf16.mxu0 %v605_v3  ;;  %v917_v9 = vld [vmem:[#allocation5 + $0x8] sm:$0xff]  ;;  %v613_v10 = vpack.c.bf16 %v89_v8, %v88_v7  ;;  %v83_v12 = vld [vmem:[#allocation2 + $0x8] sm:$0xff]  ;;  %v559_v13 = vld [vmem:[%s967_s4] ss:$0 sm:$0xff]  ;;  %632 = vset.pattern.permute.xlu1 %v792_v35  ;;  %vm794_vm4 = vmmov 0   ;;  %vm374_vm5 = vcmask 64512  }
  0x4e   :  { %608 = vmatpush3.bf16.msra.mxu0 %v605_v3  ;;  %v560_v18 = vld [vmem:[%s968_s5] ss:$0 sm:$0xff]  ;;  %v288_v29 = vsub.s32 %v285_v26, %v287_v27  ;;  %v304_v36 = vsub.s32 0, %v287_v27  ;;  %v308_v37 = vsub.s32 1, %v287_v27  ;;  %595 = vmatprep.subr.mxu1 %v793_v58  ;;  %s795_s4 = smov [#allocation11]  }
  0x4f   :  { %610 = vmatprep.subr.bf16.mxu0 %v609_v6  ;;  %596 = vmatpush3.msra.mxu1 %v913_v2  ;;  %s540_s5 = sshll.u32 %s795_s4, 4  ;;  %s541_s5 = int_to_ptr.vmem [resolvable:$true] %s540_s5 }
  0x50   :  { %597 = vmatprep.mubr.msk.f32.mxu1 %vm794_vm4, %v793_v58  ;;  %600 = vmatprep.subr.mxu1 %v793_v58  ;;  %s732_s28 = scalar_lea.vmem %s541_s5, 32  ;;  %p737_p5 = scmp.lt.s32.totalorder %s541_s5, %s541_s5 }
  0x51   :  { %582 = vmatmul.mubr.msk.f32.vlgmr.msra.gmra.mrb[0].mxu0 %vm92_vm0, %v917_v9  ;;  %p733_p4 = scmp.ne.s32.totalorder %s541_s5, %s732_s28  ;;  %p738_p6 = scmp.lt.s32.totalorder %s732_s28, %s732_s28 }
  0x52   :  { %612 = vmatpush3.bf16.msra.mxu0 %v609_v6  ;;  %592 = vmatprep.mubr.msk.f32.mxu0 %vm174_vm1, %v82_v11 }
  0x53   :  { %614 = vmatprep.subr.bf16.mxu0 %v613_v10  ;;  %p739_p7 = por %p738_p6, %p737_p5 }
  0x55   :  { %p740_p8 = pnand %p739_p7, %p733_p4 }
  0x56   :  { %616 = vmatpush3.bf16.msra.mxu0 %v613_v10 }
  0x59   :  { %593 = vmatmul.mubr.msk.f32.vlgmr.msra.gmra.mrb[0].mxu0 %vm174_vm1, %v83_v12 }
 0x12c   :  { %v594_v14 = vpop.f32.mrb[0].mxu0 }
 0x12d   :  { %v264_v15 = vadd.f32 %v594_v14, %v559_v13  ;;  %v247_v16 = vpop.f32.mrb[1].mxu0 }
 0x12e   :  { %v263_v17 = vadd.f32 %v559_v13, %v247_v16 }
 0x12f   :  { %634 = vtanh.f32 %v264_v15 }
 0x130   :  { %636 = vtanh.f32 %v263_v17 }
 0x139   :  { %v635_v19 = vpop.eup %634 }
 0x13a   :  { %v637_v20 = vpop.eup %636  ;;  %v275_v23 = vmul.f32 %v635_v19, %v560_v18 }
 0x13b   :  { %v274_v21 = vmul.f32 %v637_v20, %v560_v18 }
 0x13c   :  { %v279_v24 = vsel %vm174_vm1, %v275_v23, 0.0 }
 0x13d   :  { %v276_v22 = vsel %vm174_vm1, %v274_v21, 0.0 }
 0x13e   :  { %277 = vadd.xlane.f32.xlu0 %v276_v22 }
 0x142   :  { %280 = vadd.xlane.f32.xlu0 %v279_v24 }
 0x1cb   :  { %v278_v28 = vpop.xlane.xlu0 %277 }
 0x1cc   :  { %v289_v31 = vrot.slane %v278_v28, %v288_v29 }
 0x1cf   :  { %v281_v30 = vpop.xlane.xlu0 %280 }
 0x1d0   :  { %v293_v32 = vrot.slane %v281_v30, %v288_v29 }
 0x1d2   :  { %v295_v33 = vsel %vm294_vm2, %v293_v32, %v289_v31 }
 0x1d3   :  { %v298_v34 = vsel %vm297_vm3, %v295_v33, -inf }
 0x1d4   :  { %299 = vmax.xlane.f32.xlu1 %v298_v34 }
 0x261   :  { %v300_v38 = vpop.xlane.xlu1 %299 }
 0x262   :  { %v305_v39 = vrot.slane %v300_v38, %v304_v36  ;;  %v309_v40 = vrot.slane %v300_v38, %v308_v37 }
 0x264   :  { %v312_v41 = vsub.f32 %v278_v28, %v305_v39  ;;  %v313_v42 = vsub.f32 %v281_v30, %v309_v40 }
 0x266   :  { %v314_v43 = vmul.f32 1.442695, %v312_v41  ;;  %v316_v44 = vmul.f32 1.442695, %v313_v42 }
 0x268   :  { %638 = vpow2.f32 %v314_v43 }
 0x269   :  { %640 = vpow2.f32 %v316_v44 }
 0x272   :  { %v639_v45 = vpop.eup %638 }
 0x273   :  { %v641_v46 = vpop.eup %640  ;;  %321 = vperm.xlu1 %632, %v639_v45  }
 0x274   :  { %324 = vperm.xlu0 %633, %v641_v46  }
 0x2f2   :  { %v322_v47 = vpop.permute.xlu1 %321 }
 0x2f3   :  { %v325_v48 = vpop.permute.xlu0 %324  ;;  %v329_v49 = vrot.slane %v322_v47, %v288_v29 }
 0x2f4   :  { %v333_v50 = vrot.slane %v325_v48, %v288_v29 }
 0x2f6   :  { %v334_v51 = vsel %vm294_vm2, %v333_v50, %v329_v49 }
 0x2f7   :  { %v336_v52 = vsel %vm297_vm3, %v334_v51, 0.0 }
 0x2f8   :  { %337 = vadd.xlane.f32.xlu1 %v336_v52 }
 0x385   :  { %v338_v53 = vpop.xlane.xlu1 %337 }
 0x386   :  { %642 = vrcp.f32 %v338_v53 }
 0x390   :  { %v643_v54 = vpop.eup %642 }
 0x391   :  { %v344_v55 = vrot.slane %v643_v54, %v304_v36  ;;  %v348_v57 = vrot.slane %v643_v54, %v308_v37 }
 0x393   :  { %v351_v56 = vmul.f32 %v639_v45, %v344_v55  ;;  %v352_v59 = vmul.f32 %v641_v46, %v348_v57 }
 0x395   :  { %356 = vperm.xlu0 %633, %v351_v56  }
 0x399   :  { %359 = vperm.xlu0 %633, %v352_v59  }
 0x414   :  { %v357_v60 = vpop.permute.xlu0 %356 }
 0x415   :  { %v364_v61 = vrot.slane %v357_v60, %v288_v29 }
 0x417   :  { %598 = vmatmul.mubr.msk.f32.vlgmr.msra.gmra.mrb[0].mxu1 %vm374_vm5, %v364_v61 }
 0x418   :  { %601 = vmatpush3.msra.mxu1 %v917_v9  ;;  %v360_v62 = vpop.permute.xlu0 %359  ;;  %602 = vmatprep.mubr.msk.f32.mxu1 %vm794_vm4, %v793_v58 }
 0x419   :  { %v368_v63 = vrot.slane %v360_v62, %v288_v29 }
 0x41b   :  { %603 = vmatmul.mubr.msk.f32.vlgmr.msra.gmra.mrb[2].mxu1 %vm374_vm5, %v368_v63  ;;  %v369_v0 = vsel %vm294_vm2, %v368_v63, %v364_v61 }
 0x41c   :  { %371 = vst.msk [vmem:[#allocation11] sm:$0x3] %vm297_vm3, %v369_v0 }
 0x41d   :  { %743 = shalt.err (!%p740_p8)
}
 0x41e   :  { %s744_s8 = scalar_lea.hbm %s970_s7, 32 }
 0x41f   :  { %p745_p9 = scmp.ne.s32.totalorder %s970_s7, %s744_s8  ;;  %p748_p10 = scmp.lt.u32.totalorder %s744_s8, %s970_s7 }
 0x421   :  { %p750_p11 = pnand %p748_p10, %p745_p9 }
 0x423   :  { %753 = shalt.err (!%p750_p11)
}
 0x424   :  { %543 = dma.vmem_to_hbm [thread:$0]  %s541_s5, 32, %s970_s7, [#allocation12]   ;;  %vm519_vm6 = vcmask 122880  }
 0x425   :  { %s796_s0 = smov [#allocation10]  }
 0x426   :  { %s527_s27 = sshll.u32 %s796_s0, 4  ;;  %s528_s27 = int_to_ptr.vmem [resolvable:$true] %s527_s27 }
 0x427   :  { %s754_s17 = scalar_lea.vmem %s528_s27, 32  ;;  %p759_p13 = scmp.lt.s32.totalorder %s528_s27, %s528_s27 }
 0x428   :  { %p755_p12 = scmp.ne.s32.totalorder %s528_s27, %s754_s17  ;;  %p760_p0 = scmp.lt.s32.totalorder %s754_s17, %s754_s17 }
 0x42a   :  { %p761_p1 = por %p760_p0, %p759_p13 }
 0x42c   :  { %p762_p2 = pnand %p761_p1, %p755_p12 }
 0x4ea   :  { %v443_v1 = vpop.f32.mrb[0].mxu1 }
 0x4eb   :  { %520 = vst.msk [vmem:[#allocation10] sm:$0x1] %vm519_vm6, %v443_v1  ;;  %v599_v2 = vpop.f32.mrb[1].mxu1 }
 0x4ee   :  { %v515_v3 = vpop.f32.mrb[2].mxu1 }
 0x4ef   :  { %521 = vst.msk [vmem:[#allocation10 + $0x1] sm:$0x1] %vm519_vm6, %v515_v3  ;;  %v604_v4 = vpop.f32.mrb[3].mxu1 }
 0x4f0   :  { %765 = shalt.err (!%p762_p2)
}
 0x4f1   :  { %s766_s7 = scalar_lea.hbm %s969_s6, 32 }
 0x4f2   :  { %p767_p3 = scmp.ne.s32.totalorder %s969_s6, %s766_s7  ;;  %p770_p4 = scmp.lt.u32.totalorder %s766_s7, %s969_s6 }
 0x4f4   :  { %p772_p5 = pnand %p770_p4, %p767_p3 }
 0x4f6   :  { %775 = shalt.err (!%p772_p5)
}
 0x4f7   :  { %s797_s24 = smov 16   ;;  %s798_s1 = smov 1  }
 0x4f8   :  { %533 = dma.vmem_to_hbm [thread:$0]  %s528_s27, 32, %s969_s6, [#allocation4], %s797_s24, %s797_s24, %s798_s1  }
 0x4f9   :  { %782 = dma.done.wait [#allocation4], 32  }
 0x4fa   :  { %783 = vsyncadd [#allocation4], 4294967264 }
 0x4fb   :  { %784 = dma.done.wait [#allocation12], 32  }
 0x4fc   :  { %785 = vsyncadd [#allocation12], 4294967264 }
 0x4fd   :  { %550 = vsyncpa [#allocation3], 1 }
 0x4fe   :  { %551 = vsyncpa [#allocation6], 1 }
 0x4ff   :  { %552 = vsyncpa [#allocation9], 1 }
 0x500   :  { %553 = vsyncpa [#allocation4], 1 }
 0x501   :  { %554 = vsyncpa [#allocation12], 1 }

</bundles_post_ra>
